<compile_context>
chip_gen: v5e
topology: v5e:2x2
jax: 0.10.0
libtpu: 0.0.40
codegen_flags: <defaults>
</compile_context>

<pallas_src>
import functools

import jax
import jax.numpy as jnp
from jax.experimental import pallas as pl
from jax.experimental.pallas import tpu as pltpu


def _focal_kernel(score_ref, target_ref, sum_ref, cnt_ref, sum_acc, cnt_acc,
                  *, ignore_label, gamma, alpha, num_rows, need_row_mask):
    pb = pl.program_id(1)

    @pl.when(pb == 0)
    def _():
        sum_acc[...] = jnp.zeros_like(sum_acc)
        cnt_acc[...] = jnp.zeros_like(cnt_acc)

    s = score_ref[0].astype(jnp.float32)      # (C, TR, 128) probabilities
    t = target_ref[0]                         # (TR, 128) int32 labels
    tr = t.shape[0]

    valid = t != ignore_label
    if need_row_mask:
        # rows past the real image (last, partial row-block) are masked out
        row_ids = pb * tr + jax.lax.broadcasted_iota(jnp.int32, t.shape, 0)
        valid = jnp.logical_and(valid, row_ids < num_rows)

    # one-hot gather of the probability at the target class -> (TR, 128)
    class_ids = jax.lax.broadcasted_iota(jnp.int32, s.shape, 0)
    p_t = jnp.sum(jnp.where(class_ids == t[None], s, 0.0), axis=0)

    safe_p = jnp.where(valid, p_t, jnp.float32(1.0))   # no log(0) on masked
    ce = -jnp.log(safe_p)                              # NLL per pixel (EUP)
    one_m = 1.0 - safe_p                               # 1 - pt, pt == exp(-ce)
    if gamma == 1.0:                                   # trace-time specialization
        mod = one_m
    elif gamma == 2.0:
        mod = one_m * one_m
    else:
        mod = one_m ** gamma
    focal = mod * ce
    if alpha != 1.0:
        focal = alpha * focal
    focal = jnp.where(valid, focal, 0.0)

    sum_acc[...] += focal                              # full-vreg VPU adds
    cnt_acc[...] += valid.astype(jnp.float32)

    @pl.when(pb == pl.num_programs(1) - 1)
    def _():
        sum_ref[...] = jnp.full((1, 1, 1), jnp.sum(sum_acc[...]), jnp.float32)
        cnt_ref[...] = jnp.full((1, 1, 1), jnp.sum(cnt_acc[...]), jnp.float32)


def focal_loss_pallas(score, target, *, ignore_label=-1, gamma=1.0, alpha=1.0,
                      max_tile_rows=64):
    """score: (N, C, H, W) float probabilities; target: (N, Ht, Wt) int labels."""
    n, c, ph, pw = score.shape
    h, w = target.shape[1], target.shape[2]
    if (ph, pw) != (h, w):
        # glue: matches F.upsample(mode='bilinear', align_corners=False)
        score = jax.image.resize(score, (n, c, h, w), method="bilinear")

    p_img = h * w
    r = pl.cdiv(p_img, 128)

    score = score.reshape(n, c, p_img)                 # free (contiguous) reshape
    target = target.reshape(n, p_img).astype(jnp.int32)
    if r * 128 != p_img:
        # TODO(synk): this pad materializes score; only hit when H*W % 128 != 0
        pad = r * 128 - p_img
        score = jnp.pad(score, ((0, 0), (0, 0), (0, pad)))
        target = jnp.pad(target, ((0, 0), (0, pad)), constant_values=ignore_label)
    score = score.reshape(n, c, r, 128)
    target = target.reshape(n, r, 128)

    # largest row-tile (<= 64 rows = 8192 pixels) that keeps the two
    # double-buffered input streams + two f32 accumulators under ~24 MiB VMEM
    if r <= max_tile_rows:
        tile_rows = r
    else:
        tile_rows = max_tile_rows
        bytes_per_row = (2 * (c * score.dtype.itemsize + 4) + 2 * 4) * 128
        while tile_rows > 8 and tile_rows * bytes_per_row > 24 * 1024 * 1024:
            tile_rows //= 2
    rb = pl.cdiv(r, tile_rows)

    kernel = functools.partial(
        _focal_kernel,
        ignore_label=int(ignore_label),   # Python scalars: no captured tracers
        gamma=float(gamma),
        alpha=float(alpha),
        num_rows=int(r),
        need_row_mask=(rb * tile_rows != r),
    )

    sums, cnts = pl.pallas_call(
        kernel,
        out_shape=(jax.ShapeDtypeStruct((n, 1, 1), jnp.float32),
                   jax.ShapeDtypeStruct((n, 1, 1), jnp.float32)),
        grid_spec=pltpu.PrefetchScalarGridSpec(
            num_scalar_prefetch=0,
            grid=(n, rb),
            in_specs=[
                pl.BlockSpec((1, c, tile_rows, 128), lambda b, p: (b, 0, p, 0)),
                pl.BlockSpec((1, tile_rows, 128), lambda b, p: (b, p, 0)),
            ],
            out_specs=[
                pl.BlockSpec((1, 1, 1), lambda b, p: (b, 0, 0)),
                pl.BlockSpec((1, 1, 1), lambda b, p: (b, 0, 0)),
            ],
            scratch_shapes=[
                pltpu.VMEM((tile_rows, 128), jnp.float32),   # focal sum acc
                pltpu.VMEM((tile_rows, 128), jnp.float32),   # valid count acc
            ],
        ),
        compiler_params=pltpu.CompilerParams(
            dimension_semantics=("parallel", "arbitrary")),
    )(score, target)

    # mean over non-ignored positions (NaN if there are none, like torch)
    return jnp.sum(sums) / jnp.sum(cnts)


def focal_loss_ref(score, target, *, ignore_label=-1, gamma=1.0, alpha=1.0):
    """Pure-JAX reference mirroring the PyTorch module."""
    n, c, h, w = score.shape
    logp = jnp.log(score.astype(jnp.float32))
    lp = jnp.moveaxis(logp, 1, -1).reshape(-1, c)          # (P, C)
    t = target.reshape(-1)
    valid = t != ignore_label
    t_safe = jnp.where(valid, t, 0)
    ce = -jnp.take_along_axis(lp, t_safe[:, None], axis=1)[:, 0]
    pt = jnp.exp(-ce)
    focal = alpha * (1.0 - pt) ** gamma * ce
    return jnp.sum(jnp.where(valid, focal, 0.0)) / jnp.sum(valid)


if __name__ == "__main__":
    key = jax.random.PRNGKey(0)
    k1, k2, k3, k4, k5 = jax.random.split(key, 5)

    N, C, H, W = 2, 4, 16, 16
    # probabilities over the class axis (the module takes log of these directly)
    logits = jax.random.normal(k1, (N, C, H, W), dtype=jnp.float32)
    score = jax.nn.softmax(logits, axis=1)

    target = jax.random.randint(k2, (N, H, W), 0, C, dtype=jnp.int32)
    # sprinkle in some ignored positions to exercise the mask path
    ignore_mask = jax.random.uniform(k3, (N, H, W)) < 0.2
    target = jnp.where(ignore_mask, jnp.int32(-1), target)

    # default module config: gamma=1, alpha=1
    out = focal_loss_pallas(score, target, ignore_label=-1, gamma=1.0, alpha=1.0)
    out = jax.block_until_ready(out)
    ref = focal_loss_ref(score, target, ignore_label=-1, gamma=1.0, alpha=1.0)
    ref = jax.block_until_ready(ref)
    assert jnp.allclose(out, ref, rtol=1e-5, atol=1e-6), (out, ref)

    # second config exercises the gamma==2 / alpha!=1 specialization branches
    out2 = focal_loss_pallas(score, target, ignore_label=-1, gamma=2.0, alpha=0.25)
    out2 = jax.block_until_ready(out2)
    ref2 = focal_loss_ref(score, target, ignore_label=-1, gamma=2.0, alpha=0.25)
    ref2 = jax.block_until_ready(ref2)
    assert jnp.allclose(out2, ref2, rtol=1e-5, atol=1e-6), (out2, ref2)

    # third config: H*W not a multiple of 128 -> exercises the lane-pad path
    H3, W3 = 12, 12
    logits3 = jax.random.normal(k4, (N, C, H3, W3), dtype=jnp.float32)
    score3 = jax.nn.softmax(logits3, axis=1)
    target3 = jax.random.randint(k5, (N, H3, W3), 0, C, dtype=jnp.int32)
    out3 = focal_loss_pallas(score3, target3, ignore_label=-1, gamma=1.0, alpha=1.0)
    out3 = jax.block_until_ready(out3)
    ref3 = focal_loss_ref(score3, target3, ignore_label=-1, gamma=1.0, alpha=1.0)
    ref3 = jax.block_until_ready(ref3)
    assert jnp.allclose(out3, ref3, rtol=1e-5, atol=1e-6), (out3, ref3)

    print("KERNEL_OK")
</pallas_src>

<mosaic_0001>
module attributes {stable_mosaic.version = 11 : i64} {
  func.func @_focal_kernel(%arg0: i32, %arg1: i32, %arg2: memref<1x4x2x128xf32, #tpu.memory_space<vmem>>, %arg3: memref<1x2x128xi32, #tpu.memory_space<vmem>>, %arg4: memref<1x1x1xf32, #tpu.memory_space<vmem>>, %arg5: memref<1x1x1xf32, #tpu.memory_space<vmem>>, %arg6: memref<2x128xf32, #tpu.memory_space<vmem>>, %arg7: memref<2x128xf32, #tpu.memory_space<vmem>>) attributes {dimension_semantics = [#tpu.dimension_semantics<parallel>, #tpu.dimension_semantics<arbitrary>], iteration_bounds = array<i64: 2, 1>, scalar_prefetch = 0 : i64, scratch_operands = 2 : i64, tpu.core_type = #tpu.core_type<tc>, window_params = [{transform_indices = @transform_0, window_bounds = array<i64: 1, 4, 2, 128>}, {transform_indices = @transform_1, window_bounds = array<i64: 1, 2, 128>}, {transform_indices = @transform_2, window_bounds = array<i64: 1, 1, 1>}, {transform_indices = @transform_3, window_bounds = array<i64: 1, 1, 1>}]} {
    %c0_i32 = arith.constant 0 : i32
    %0 = arith.cmpi eq, %arg1, %c0_i32 : i32
    %1 = arith.extui %0 : i1 to i32
    %c0_i32_0 = arith.constant 0 : i32
    %2 = arith.cmpi ne, %1, %c0_i32_0 : i32
    scf.if %2 {
      %cst_22 = arith.constant 0.000000e+00 : f32
      %37 = vector.broadcast %cst_22 : f32 to vector<2x128xf32>
      %c0_23 = arith.constant 0 : index
      %c0_24 = arith.constant 0 : index
      %38 = vector.load %arg6[%c0_23, %c0_24] : memref<2x128xf32, #tpu.memory_space<vmem>>, vector<2x128xf32>
      tpu.vector_store %arg6[%c0_23, %c0_24], %37 {strides = array<i32>} : memref<2x128xf32, #tpu.memory_space<vmem>>, vector<2x128xf32>,
      %cst_25 = arith.constant 0.000000e+00 : f32
      %39 = vector.broadcast %cst_25 : f32 to vector<2x128xf32>
      %c0_26 = arith.constant 0 : index
      %c0_27 = arith.constant 0 : index
      %40 = vector.load %arg7[%c0_26, %c0_27] : memref<2x128xf32, #tpu.memory_space<vmem>>, vector<2x128xf32>
      tpu.vector_store %arg7[%c0_26, %c0_27], %39 {strides = array<i32>} : memref<2x128xf32, #tpu.memory_space<vmem>>, vector<2x128xf32>,
    } else {
    }
    %c0 = arith.constant 0 : index
    %c0_1 = arith.constant 0 : index
    %c0_2 = arith.constant 0 : index
    %c0_3 = arith.constant 0 : index
    %3 = vector.load %arg2[%c0, %c0_1, %c0_2, %c0_3] : memref<1x4x2x128xf32, #tpu.memory_space<vmem>>, vector<1x4x2x128xf32>
    %4 = vector.shape_cast %3 : vector<1x4x2x128xf32> to vector<4x2x128xf32>
    %c0_4 = arith.constant 0 : index
    %c0_5 = arith.constant 0 : index
    %c0_6 = arith.constant 0 : index
    %5 = vector.load %arg3[%c0_4, %c0_5, %c0_6] : memref<1x2x128xi32, #tpu.memory_space<vmem>>, vector<1x2x128xi32>
    %6 = vector.shape_cast %5 : vector<1x2x128xi32> to vector<2x128xi32>
    %c-1_i32 = arith.constant -1 : i32
    %7 = vector.broadcast %c-1_i32 : i32 to vector<2x128xi32>
    %8 = arith.cmpi ne, %6, %7 : vector<2x128xi32>
    %9 = tpu.iota {dimensions = array<i32: 0>} : vector<4x2x128xi32>
    %10 = vector.shape_cast %6 : vector<2x128xi32> to vector<1x2x128xi32>
    %11 = vector.broadcast %10 : vector<1x2x128xi32> to vector<4x2x128xi32>
    %12 = arith.cmpi eq, %9, %11 : vector<4x2x128xi32>
    %cst = arith.constant 0.000000e+00 : f32
    %13 = vector.broadcast %cst : f32 to vector<4x2x128xf32>
    %14 = arith.select %12, %4, %13 : vector<4x2x128xi1>, vector<4x2x128xf32>
    %cst_7 = arith.constant dense<0.000000e+00> : vector<2x128xf32>
    %15 = vector.multi_reduction <add>, %14, %cst_7 [0] : vector<4x2x128xf32> to vector<2x128xf32>
    %cst_8 = arith.constant 1.000000e+00 : f32
    %16 = vector.broadcast %cst_8 : f32 to vector<2x128xf32>
    %17 = arith.select %8, %15, %16 : vector<2x128xi1>, vector<2x128xf32>
    %18 = math.log %17 : vector<2x128xf32>
    %cst_9 = arith.constant 0.000000e+00 : f32
    %19 = vector.broadcast %cst_9 : f32 to vector<2x128xf32>
    %20 = arith.subf %19, %18 : vector<2x128xf32>
    %cst_10 = arith.constant 1.000000e+00 : f32
    %21 = vector.broadcast %cst_10 : f32 to vector<2x128xf32>
    %22 = arith.subf %21, %17 : vector<2x128xf32>
    %23 = arith.mulf %22, %20 : vector<2x128xf32>
    %cst_11 = arith.constant 0.000000e+00 : f32
    %24 = vector.broadcast %cst_11 : f32 to vector<2x128xf32>
    %25 = arith.select %8, %23, %24 : vector<2x128xi1>, vector<2x128xf32>
    %c0_12 = arith.constant 0 : index
    %c0_13 = arith.constant 0 : index
    %26 = vector.load %arg6[%c0_12, %c0_13] : memref<2x128xf32, #tpu.memory_space<vmem>>, vector<2x128xf32>
    %27 = arith.addf %26, %25 : vector<2x128xf32>
    %c0_14 = arith.constant 0 : index
    %c0_15 = arith.constant 0 : index
    %28 = vector.load %arg6[%c0_14, %c0_15] : memref<2x128xf32, #tpu.memory_space<vmem>>, vector<2x128xf32>
    tpu.vector_store %arg6[%c0_14, %c0_15], %27 {strides = array<i32>} : memref<2x128xf32, #tpu.memory_space<vmem>>, vector<2x128xf32>,
    %c0_16 = arith.constant 0 : index
    %c0_17 = arith.constant 0 : index
    %29 = vector.load %arg7[%c0_16, %c0_17] : memref<2x128xf32, #tpu.memory_space<vmem>>, vector<2x128xf32>
    %30 = arith.extui %8 : vector<2x128xi1> to vector<2x128xi32>
    %31 = arith.sitofp %30 : vector<2x128xi32> to vector<2x128xf32>
    %32 = arith.addf %29, %31 : vector<2x128xf32>
    %c0_18 = arith.constant 0 : index
    %c0_19 = arith.constant 0 : index
    %33 = vector.load %arg7[%c0_18, %c0_19] : memref<2x128xf32, #tpu.memory_space<vmem>>, vector<2x128xf32>
    tpu.vector_store %arg7[%c0_18, %c0_19], %32 {strides = array<i32>} : memref<2x128xf32, #tpu.memory_space<vmem>>, vector<2x128xf32>,
    %c0_i32_20 = arith.constant 0 : i32
    %34 = arith.cmpi eq, %arg1, %c0_i32_20 : i32
    %35 = arith.extui %34 : i1 to i32
    %c0_i32_21 = arith.constant 0 : i32
    %36 = arith.cmpi ne, %35, %c0_i32_21 : i32
    scf.if %36 {
      %c0_22 = arith.constant 0 : index
      %c0_23 = arith.constant 0 : index
      %37 = vector.load %arg6[%c0_22, %c0_23] : memref<2x128xf32, #tpu.memory_space<vmem>>, vector<2x128xf32>
      %38 = vector.shape_cast %37 : vector<2x128xf32> to vector<1x2x128xf32>
      %cst_24 = arith.constant dense<0.000000e+00> : vector<1xf32>
      %39 = vector.multi_reduction <add>, %38, %cst_24 [1, 2] : vector<1x2x128xf32> to vector<1xf32>
      %40 = vector.shape_cast %39 : vector<1xf32> to vector<1x1x1xf32>
      %41 = vector.extract %40[0, 0, 0] : f32 from vector<1x1x1xf32>
      %42 = vector.broadcast %41 : f32 to vector<1x1x1xf32>
      %c0_25 = arith.constant 0 : index
      %c0_26 = arith.constant 0 : index
      %c0_27 = arith.constant 0 : index
      %43 = vector.load %arg4[%c0_25, %c0_26, %c0_27] : memref<1x1x1xf32, #tpu.memory_space<vmem>>, vector<1x1x1xf32>
      tpu.vector_store %arg4[%c0_25, %c0_26, %c0_27], %42 {strides = array<i32>} : memref<1x1x1xf32, #tpu.memory_space<vmem>>, vector<1x1x1xf32>,
      %c0_28 = arith.constant 0 : index
      %c0_29 = arith.constant 0 : index
      %44 = vector.load %arg7[%c0_28, %c0_29] : memref<2x128xf32, #tpu.memory_space<vmem>>, vector<2x128xf32>
      %45 = vector.shape_cast %44 : vector<2x128xf32> to vector<1x2x128xf32>
      %cst_30 = arith.constant dense<0.000000e+00> : vector<1xf32>
      %46 = vector.multi_reduction <add>, %45, %cst_30 [1, 2] : vector<1x2x128xf32> to vector<1xf32>
      %47 = vector.shape_cast %46 : vector<1xf32> to vector<1x1x1xf32>
      %48 = vector.extract %47[0, 0, 0] : f32 from vector<1x1x1xf32>
      %49 = vector.broadcast %48 : f32 to vector<1x1x1xf32>
      %c0_31 = arith.constant 0 : index
      %c0_32 = arith.constant 0 : index
      %c0_33 = arith.constant 0 : index
      %50 = vector.load %arg5[%c0_31, %c0_32, %c0_33] : memref<1x1x1xf32, #tpu.memory_space<vmem>>, vector<1x1x1xf32>
      tpu.vector_store %arg5[%c0_31, %c0_32, %c0_33], %49 {strides = array<i32>} : memref<1x1x1xf32, #tpu.memory_space<vmem>>, vector<1x1x1xf32>,
    } else {
    }
    return
  }
  func.func @transform_0(%arg0: i32, %arg1: i32) -> (i32, i32, i32, i32) {
    %c0_i32 = arith.constant 0 : i32
    %c0_i32_0 = arith.constant 0 : i32
    %c0_i32_1 = arith.constant 0 : i32
    return %arg0, %c0_i32, %arg1, %c0_i32_0 : i32, i32, i32, i32
  }
  func.func @transform_1(%arg0: i32, %arg1: i32) -> (i32, i32, i32) {
    %c0_i32 = arith.constant 0 : i32
    %c0_i32_0 = arith.constant 0 : i32
    return %arg0, %arg1, %c0_i32 : i32, i32, i32
  }
  func.func @transform_2(%arg0: i32, %arg1: i32) -> (i32, i32, i32) {
    %c0_i32 = arith.constant 0 : i32
    %c0_i32_0 = arith.constant 0 : i32
    %c0_i32_1 = arith.constant 0 : i32
    return %arg0, %c0_i32, %c0_i32_0 : i32, i32, i32
  }
  func.func @transform_3(%arg0: i32, %arg1: i32) -> (i32, i32, i32) {
    %c0_i32 = arith.constant 0 : i32
    %c0_i32_0 = arith.constant 0 : i32
    %c0_i32_1 = arith.constant 0 : i32
    return %arg0, %c0_i32, %c0_i32_0 : i32, i32, i32
  }
}

</mosaic_0001>

<bundles_post_ra>
// kernel: tpu_custom_call.1
= control target key start
LH: loop header
LB: loop body
LE: loop exit
PB: predicated region body
PF: predicated region fallthrough
CT: control target
= control target key end

     0   :  { %9 = vsyncpa [#allocation5], 0  ;;  %s786_s0 = inlined_call_operand.hbm [shape: f32[2,4,2,128], index: 0, kind: input, shape index: {}]   ;;  %s787_s1 = inlined_call_operand.hbm [shape: s32[2,2,128], index: 1, kind: input, shape index: {}]   ;;  %s788_s2 = inlined_call_operand.vmem [shape: f32[2,1,1], index: 2, kind: output, shape index: {0}]   ;;  %s789_s3 = inlined_call_operand.vmem [shape: f32[2,1,1], index: 3, kind: output, shape index: {1}]  }
   0x1   :  { %11 = vsyncpa [#allocation5 + $0x1], 0 }
   0x2   :  { %12 = vsyncpa [#allocation7], 0 }
   0x3   :  { %14 = vsyncpa [#allocation7 + $0x1], 0  ;;  %s670_s12 = smov 0   ;;  %s672_s13 = smov 0  }
   0x4   :  { %s674_s14 = smov 0   ;;  %s676_s15 = smov 0  }
   0x5   :  { %s678_s16 = smov 0   ;;  %s680_s17 = smov 0  }
   0x6 LB: > { %s446_s18 = sadd.s32 4294967295, %s645_s17   ;;  %s32_s19 = sadd.s32 1, %s641_s16  ;;  %s645_s17 = sphi %s680_s17, %s20_s17   ;;  %s641_s16 = sphi %s678_s16, %s797_s16   ;;  %s637_s15 = sphi %s676_s15, %s796_s15   ;;  %s633_s14 = sphi %s674_s14, %s795_s14   ;;  %s629_s13 = sphi %s672_s13, %s794_s13   ;;  %s625_s12 = sphi %s670_s12, %s793_s12  }
   0x7   : > { %p34_p0 = scmp.ge.s32.totalorder %s32_s19, 2  ;;  %s41_s20 = sadd.s32 1, %s633_s14 }
   0x8   : > { %p48_p1 = scmp.ne.s32.totalorder %s633_s14, %s629_s13  ;;  %p49_p2 = scmp.eq.s32.totalorder %s645_s17, 0 }
   0x9   : > { %s799_s19 = smov (%p34_p0, %s32_s19), 0  ;;  %p54_p4 = scmp.ne.s32.totalorder %s629_s13, %s625_s12 }
   0xa   : > { %p706_p3 = por %p49_p2, %p48_p1  ;;  %s36_s22 = ssub.s32 %s641_s16, %s799_s19 }
   0xb   : > { %p55_p5 = scmp.eq.s32.totalorder %s446_s18, 0  ;;  %p39_p6 = scmp.eq.s32.totalorder %s36_s22, 0 }
   0xc   : > { %p477_p8 = scmp.lt.s32.totalorder %s645_s17, 2  ;;  %s158_s25 = sand.u32 1, %s633_s14  }
   0xd   : > { %p713_p7 = por %p55_p5, %p54_p4  ;;  %s461_s26 = sshll.u32 %s641_s16, 3 }
   0xe   : > { %s719_s24 = scalar_select %p39_p6, %s633_s14, %s41_s20  }
   0xf   : > { %s450_s27 = sshll.u32 %s158_s25, 3  ;;  %s168_s30 = scalar_lea.hbm %s786_s0, %s461_s26 }
  0x10   : > { %s169_s4 = sshll.u32 %s168_s30, 4  ;;  %s162_s5 = scalar_lea.vmem [#allocation4], %s450_s27  ;;  %s170_s4 = int_to_ptr.hbm [resolvable:$true] %s169_s4 }
  0x11   : > { %s171_s6 = sshll.u32 %s162_s5, 4  ;;  %p728_p9 = pnand %p477_p8, %p706_p3  ;;  %s172_s6 = int_to_ptr.vmem [resolvable:$true] %s171_s6 }
  0x12   : > { %p455_p10 = scmp.ge.s32.totalorder %s645_s17, 1  ;;  %p199_p11 = scmp.lt.s32.totalorder %s645_s17, 3 }
  0x13   : > { %s159_s8 = scalar_lea.sflag [#allocation5], %s158_s25  ;;  %s647_s9 = smov 32  }
  0x14   : > { %s648_s10 = smov 2   ;;  %p200_p12 = pnand %p455_p10, %p199_p11 }
  0x15   : > { %473 = dma.hbm_to_vmem [thread:$0]  (!%p728_p9), %s170_s4, 128, %s172_s6, %s159_s8, %s647_s9, %s647_s9, %s648_s10  }
  0x16   : > { %s453_s11 = sshll.u32 %s158_s25, 1  ;;  %s454_s12 = sshll.u32 %s641_s16, 1 }
  0x17   : > { %s190_s21 = scalar_lea.hbm %s787_s1, %s454_s12  ;;  %s185_s26 = scalar_lea.vmem [#allocation6], %s453_s11 }
  0x18   : > { %s192_s22 = sshll.u32 %s190_s21, 4  ;;  %s194_s27 = sshll.u32 %s185_s26, 4  ;;  %s193_s22 = int_to_ptr.hbm [resolvable:$true] %s192_s22  ;;  %s195_s27 = int_to_ptr.vmem [resolvable:$true] %s194_s27 }
  0x19   : > { %s182_s28 = scalar_lea.sflag [#allocation7], %s158_s25  ;;  %203 = sbr.rel (%p200_p12) target bundleno = 260 (0x104), region = 28 }
  0x1a   : > { %476 = dma.hbm_to_vmem [thread:$0]  (!%p728_p9), %s193_s22, 32, %s195_s27, %s182_s28  }
  0x1b   : > { %s205_s29 = sand.u32 (!%p200_p12), 1, %s629_s13  }
  0x1c   : > { %s456_s30 = sshll.u32 (!%p200_p12), %s205_s29, 3  ;;  %s206_s4 = scalar_lea.sflag (!%p200_p12), [#allocation5], %s205_s29 }
  0x1d   : > { %s209_s5 = scalar_lea.vmem (!%p200_p12), [#allocation4], %s456_s30 }
  0x1e   : > { %616 = dma.done.wait (%p713_p7), %s206_s4, 128  }
  0x1f   : > { %618 = vsyncadd (%p713_p7), %s206_s4, 4294967168  ;;  %s457_s6 = sshll.u32 %s205_s29, 1  ;;  %s216_s8 = scalar_lea.sflag [#allocation7], %s205_s29 }
  0x20   : > { %s219_s9 = scalar_lea.vmem [#allocation6], %s457_s6 }
  0x21   : > { %620 = dma.done.wait (%p713_p7), %s216_s8, 32  }
  0x22   : > { %622 = vsyncadd (%p713_p7), %s216_s8, 4294967264  ;;  %v649_v0 = vmov 0.0   ;;  %v261_v1 = vld [vmem:[%s209_s5] sm:$0x3]  ;;  %v262_v2 = vld [vmem:[%s209_s5 + $0x2] sm:$0x3] }
  0x23   : > { %259 = vst [vmem:[#allocation2] sm:$0x3] %v649_v0  ;;  %v263_v3 = vld [vmem:[%s209_s5 + $0x4] sm:$0x3]  ;;  %v264_v4 = vld [vmem:[%s209_s5 + $0x6] sm:$0x3] }
  0x24   : > { %260 = vst [vmem:[#allocation3] sm:$0x3] %v649_v0  ;;  %v265_v5 = vld [vmem:[%s219_s9] sm:$0x3]  ;;  %vm275_vm0 = vcmask 1041408   ;;  %p249_p13 = scmp.lt.s32.totalorder %s637_s15, 1 }
  0x25   : > { %vm266_vm1 = vcmp.ne.s32.totalorder %v265_v5, 4294967295  ;;  %vm267_vm2 = vcmp.eq.s32.totalorder %v265_v5, 0  ;;  %vm268_vm3 = vcmp.eq.s32.totalorder %v265_v5, 1  ;;  %vm269_vm4 = vcmp.eq.s32.totalorder %v265_v5, 2 }
  0x26   : > { %vm270_vm5 = vcmp.eq.s32.totalorder %v265_v5, 3  ;;  %v271_v6 = vsel %vm267_vm2, %v261_v1, 0.0  ;;  %v272_v7 = vsel %vm268_vm3, %v262_v2, 0.0  ;;  %v273_v8 = vsel %vm269_vm4, %v263_v3, 0.0  ;;  %s801_s15 = smov (!%p249_p13, %s637_s15), 1 }
  0x27   : > { %v274_v10 = vsel %vm270_vm5, %v264_v4, 0.0  ;;  %v276_v11 = vsel %vm275_vm0, %v271_v6, 0.0  ;;  %v277_v12 = vsel %vm275_vm0, %v272_v7, 0.0  ;;  %v279_v13 = vsel %vm275_vm0, %v273_v8, 0.0  ;;  %s251_s7 = scalar_lea.vmem %s788_s2, %s801_s15  ;;  %s254_s18 = scalar_lea.vmem %s789_s3, %s801_s15 }
  0x28   : > { %v278_v14 = vadd.f32 %v277_v12, %v276_v11  ;;  %v458_v15 = vsel %vm266_vm1, 1.0, %v649_v0  ;;  %v281_v16 = vsel %vm275_vm0, %v274_v10, 0.0  ;;  %vm313_vm6 = vcmask 0  }
  0x2a   : > { %v280_v18 = vadd.f32 %v279_v13, %v278_v14  ;;  %v290_v26 = vld [vmem:[#allocation2] sm:$0x3] }
  0x2b   : > { %v293_v9 = vld [vmem:[#allocation3] sm:$0x3] }
  0x2c   : > { %v296_v17 = vadd.f32 %v458_v15, %v293_v9  ;;  %v282_v19 = vadd.f32 %v281_v16, %v280_v18 }
  0x2e   : > { %297 = vst [vmem:[#allocation3] sm:$0x3] %v296_v17  ;;  %v283_v20 = vsel %vm266_vm1, %v282_v19, 1.0 }
  0x2f   : > { %529 = vlog2.f32 %v283_v20  ;;  %v287_v23 = vsub.f32 1.0, %v283_v20 }
  0x35   : > { %v530_v21 = vpop.eup %529  ;;  %v315_v31 = vld [vmem:[#allocation3] sm:$0x3] }
  0x36   : > { %v285_v22 = vmul.f32 0.6931472, %v530_v21  ;;  %v316_v32 = vsel %vm275_vm0, %v315_v31, 0.0 }
  0x38   : > { %v286_v24 = vsub.f32 0.0, %v285_v22 }
  0x3a   : > { %v288_v25 = vmul.f32 %v287_v23, %v286_v24 }
  0x3c   : > { %v289_v27 = vsel %vm266_vm1, %v288_v25, 0.0 }
  0x3d   : > { %v291_v28 = vadd.f32 %v290_v26, %v289_v27 }
  0x3f   : > { %292 = vst [vmem:[#allocation2] sm:$0x3] %v291_v28 }
  0x46   : > { %v301_v29 = vld [vmem:[#allocation2] sm:$0x3] }
  0x47   : > { %v302_v30 = vsel %vm275_vm0, %v301_v29, 0.0 }
  0x48   : > { %303 = vadd.xlane.f32.xlu0 %v302_v30 }
  0x50   : > { %317 = vadd.xlane.f32.xlu0 %v316_v32 }
  0xbb   : > { %v304_v33 = vpop.xlane.xlu0 %303 }
  0xbc   : > { %v305_v34 = vrot.slane %v304_v33, 4 }
  0xbe   : > { %v306_v35 = vadd.f32 %v305_v34, %v304_v33 }
  0xc0   : > { %v307_v36 = vrot.slane %v306_v35, 2 }
  0xc2   : > { %v308_v37 = vadd.f32 %v307_v36, %v306_v35 }
  0xc3   : > { %v318_v38 = vpop.xlane.xlu0 %317 }
  0xc4   : > { %v319_v39 = vrot.slane %v318_v38, 4  ;;  %v309_v40 = vrot.slane %v308_v37, 1 }
  0xc6   : > { %v320_v41 = vadd.f32 %v319_v39, %v318_v38  ;;  %v310_v42 = vadd.f32 %v309_v40, %v308_v37 }
  0xc8   : > { %v321_v43 = vrot.slane %v320_v41, 2  ;;  %462 = vpush %v310_v42 }
  0xca   : > { %v322_v44 = vadd.f32 %v321_v43, %v320_v41 }
  0xcc   : > { %v323_v45 = vrot.slane %v322_v44, 1 }
  0xce   : > { %v324_v46 = vadd.f32 %v323_v45, %v322_v44 }
  0xd0   : > { %464 = vpush %v324_v46 }
  0xf9   : > { %s463_s10 = spop %462 }
  0xfa   : > { %v312_v47 = vstv %s463_s10 }
  0xfb   : > { %314 = vst.msk [vmem:[%s251_s7] sm:$0x1] %vm313_vm6, %v312_v47 }
 0x101   : > { %s465_s20 = spop %464 }
 0x102   : > { %v326_v48 = vstv %s465_s20 }
 0x103   : > { %327 = vst.msk [vmem:[%s254_s18] sm:$0x1] %vm313_vm6, %v326_v48 }
 0x104 PF: > { %s20_s17 = sadd.s32 1, %s645_s17   ;;  %s793_s12 = smov %s629_s13 }
 0x105   : > { %p17_p0 = scmp.ge.s32.totalorder %s20_s17, 4   ;;  %s794_s13 = smov %s633_s14 }
 0x106   : > { %s795_s14 = smov %s719_s24  ;;  %s796_s15 = smov %s641_s16 }
 0x107   : > { %s797_s16 = smov %s799_s19  ;;  %19 = sbr.rel (!%p17_p0) target bundleno = 6 (0x6), region = 101 }
 0x10c   :  { %357 = vsyncpa [#allocation5], 1 }
 0x10d   :  { %359 = vsyncpa [#allocation5 + $0x1], 1 }
 0x10e   :  { %360 = vsyncpa [#allocation7], 1 }
 0x10f   :  { %362 = vsyncpa [#allocation7 + $0x1], 1 }

</bundles_post_ra>
